<compile_context>
chip_gen: v7x
topology: tpu7x:2x2x1
jax: 0.10.0
libtpu: 0.0.40
codegen_flags: <defaults>
</compile_context>

<pallas_src>
import math

import jax
import jax.numpy as jnp
from jax.experimental import pallas as pl
from jax.experimental.pallas import tpu as pltpu


_MAX_TILE_ROWS = 4096
_MAX_FOLDED_WEIGHT_BYTES = 4 * 1024 * 1024
_MIN_SPLIT_TILE_ROWS = 256          # don't shrink tiles below this just to add steps


def _round_up(a, b):
    return -(-a // b) * b


def _round_down(a, b):
    return (a // b) * b


def _cdiv(a, b):
    return -(-a // b)


def _sublane_rows(itemsize):
    # (8,128) vregs hold 8 rows of 32-bit data; sub-32-bit packs along sublanes.
    return max(8, 32 // max(1, itemsize))


def _vmem_budgets():
    """(tile_budget_bytes, vmem_limit_bytes) per TPU generation."""
    cap = None
    try:
        cap = getattr(pltpu.get_tpu_info(), "vmem_capacity_bytes", None)
    except Exception:
        cap = None
    if cap is not None and cap >= 100 * 1024 * 1024:
        # 128 MiB parts (v5e / v6e): big tiles amortize per-step overhead.
        return 72 * 1024 * 1024, 96 * 1024 * 1024
    # 64 MiB parts (v7x) or unknown: stay conservative.
    return 20 * 1024 * 1024, 48 * 1024 * 1024


def _choose_fold(C, E, w_itemsize):
    """Pick the fold factor k (pixels per folded row).

    Goal: k*E % 128 == 0 so the OUTPUT tile is lane-dense (the biggest store
    lever).  Prefer k = 128 // C (also lane-dense input, 128-wide contraction
    matching v5e's MXU) when compatible.  Never fold if E is already a
    multiple of 128 -- the kron would only inflate MXU work and weight VMEM.
    """
    if E % 128 == 0:
        return 1
    k_out = 128 // math.gcd(E, 128)            # smallest k with (k*E) % 128 == 0
    candidates = []
    if 128 % C == 0 and (128 // C) % k_out == 0:
        candidates.append(128 // C)            # lane-dense input AND output
    candidates.append(k_out)                   # lane-dense output only
    for k in candidates:
        if k > 1 and (k * C) * (k * E) * w_itemsize <= _MAX_FOLDED_WEIGHT_BYTES:
            return k
    return 1


def _choose_tile_rows(m_rows_pad, row_in_bytes, row_out_bytes, row_acc_bytes,
                      const_bytes, sublane, tile_budget):
    """Largest sublane-multiple row tile that fits the VMEM budget, capped,
    and split so the grid keeps enough steps for pipelining / dual-TC parts."""
    avail = tile_budget - 2 * const_bytes                       # weight+bias, 2 bufs
    per_row = 2 * (row_in_bytes + row_out_bytes) + row_acc_bytes
    tile = avail // per_row
    tile = max(sublane, _round_down(min(tile, _MAX_TILE_ROWS), sublane))
    tile = min(tile, m_rows_pad)                                # m_rows_pad % sublane == 0
    # Prefer >= 8 grid steps (>= 4 per TensorCore on dual-TC v7x) so input DMA,
    # MXU and writeback overlap -- but never below _MIN_SPLIT_TILE_ROWS rows.
    for steps in (8, 4, 2):
        cand = _round_down(_cdiv(m_rows_pad, steps), sublane)
        if cand >= _MIN_SPLIT_TILE_ROWS:
            tile = min(tile, cand)
            break
    return tile


def _pixel_embed_kernel(x_ref, w_ref, b_ref, o_ref):
    # x_ref: (TM, Kf), w_ref: (Kf, Ef), b_ref: (1, Ef) f32, o_ref: (TM, Ef)
    x = x_ref[...]
    w = w_ref[...]
    if x.dtype != w.dtype:
        # In-kernel cast (f32 -> bf16): free VPU work on VMEM data, keeps the
        # HBM traffic in the original dtype and the MXU on its fast bf16 path.
        x = x.astype(w.dtype)
    acc = jnp.dot(x, w, preferred_element_type=jnp.float32)
    acc = acc + b_ref[...]                      # bias add in f32
    o_ref[...] = acc.astype(o_ref.dtype)


def pixel_embed_linear(x_nchw, weight, bias, *, mxu_dtype=jnp.bfloat16):
    """x_nchw: (B, C, H, W); weight: (C, E); bias: (E,).  Returns (B, H*W, E)."""
    B, C, H, W = x_nchw.shape
    Cw, E = weight.shape
    assert Cw == C, (Cw, C)
    M = B * H * W
    x_itemsize = jnp.dtype(x_nchw.dtype).itemsize

    # MXU operand dtype: cast f32 -> bf16 (f32 accumulate) unless disabled.
    cast_for_mxu = (mxu_dtype is not None
                    and jnp.dtype(x_nchw.dtype) == jnp.dtype(jnp.float32)
                    and jnp.dtype(mxu_dtype) != jnp.dtype(jnp.float32))
    w_dtype = jnp.dtype(mxu_dtype) if cast_for_mxu else jnp.dtype(weight.dtype)
    w_itemsize = w_dtype.itemsize

    # ---- fold k pixels into the lane dimension ------------------------------
    k = _choose_fold(C, E, w_itemsize)
    Kf, Ef = k * C, k * E

    # NCHW -> NHWC -> (M, C) glue stays in XLA (transpose + pad + reshape fuse
    # into one copy pass).
    # TODO(synk): verify in HLO that the final [:M] slice fuses into the
    # consumer for ragged M; otherwise return the padded slab + valid length.
    x2d = jnp.transpose(x_nchw, (0, 2, 3, 1)).reshape(M, C)

    sublane = _sublane_rows(x_itemsize)
    m_rows = _cdiv(M, k)
    m_rows_pad = _round_up(m_rows, sublane)      # pad to sublane only, NOT tile
    M_pad = m_rows_pad * k
    if M_pad != M:
        x2d = jnp.pad(x2d, ((0, M_pad - M), (0, 0)))
    x_folded = x2d.reshape(m_rows_pad, Kf)

    # Block-diagonal folded weight kron(I_k, W) (exact), bias repeated per pixel.
    w_cast = weight.astype(w_dtype)
    w_bd = jnp.kron(jnp.eye(k, dtype=w_dtype), w_cast) if k > 1 else w_cast
    b_bd = jnp.tile(bias.astype(jnp.float32), k).reshape(1, Ef)

    const_bytes = Kf * Ef * w_itemsize + Ef * 4
    tile_budget, vmem_limit = _vmem_budgets()
    tile_rows = _choose_tile_rows(
        m_rows_pad,
        row_in_bytes=Kf * x_itemsize,
        row_out_bytes=Ef * x_itemsize,
        row_acc_bytes=Ef * 4,                    # f32 matmul-result temporary
        const_bytes=const_bytes,
        sublane=sublane,
        tile_budget=tile_budget,
    )
    grid_m = _cdiv(m_rows_pad, tile_rows)        # ragged last block is clipped

    # True cost (not the k-inflated kron FLOPs) so XLA treats this as mem-bound.
    cost = pl.CostEstimate(
        flops=2 * M * C * E,
        transcendentals=0,
        bytes_accessed=(M * C * x_itemsize + M * E * x_itemsize
                        + Kf * Ef * w_itemsize + Ef * 4),
    )

    out_folded = pl.pallas_call(
        _pixel_embed_kernel,
        out_shape=jax.ShapeDtypeStruct((m_rows_pad, Ef), x_nchw.dtype),
        grid_spec=pltpu.PrefetchScalarGridSpec(
            num_scalar_prefetch=0,
            grid=(grid_m,),
            in_specs=[
                pl.BlockSpec((tile_rows, Kf), lambda i: (i, 0)),   # folded X tile
                # Constant index_maps: DMA'd once across the grid; their
                # default double-buffers are accounted for in the budget math.
                pl.BlockSpec((Kf, Ef), lambda i: (0, 0)),          # folded weight
                pl.BlockSpec((1, Ef), lambda i: (0, 0)),           # folded bias (f32)
            ],
            out_specs=pl.BlockSpec((tile_rows, Ef), lambda i: (i, 0)),
        ),
        compiler_params=pltpu.CompilerParams(
            dimension_semantics=("parallel",),
            vmem_limit_bytes=vmem_limit,
        ),
        cost_estimate=cost,
    )(x_folded, w_bd, b_bd)

    out2d = out_folded.reshape(M_pad, E)
    if M_pad != M:
        out2d = out2d[:M]
    return out2d.reshape(B, H * W, E)


def _reference(x, weight, bias):
    """Plain-JAX PixelEmbed_Linear (full f32 matmul precision)."""
    B, C, H, W = x.shape
    x2d = jnp.transpose(x, (0, 2, 3, 1)).reshape(-1, C)
    y = jnp.dot(x2d, weight, precision=jax.lax.Precision.HIGHEST) + bias
    return y.reshape(B, H * W, -1)


if __name__ == "__main__":
    def make_inputs(key, B, C, H, W, E):
        kx, kw, kb = jax.random.split(key, 3)
        x = jax.random.normal(kx, (B, C, H, W), dtype=jnp.float32)
        bound = 1.0 / math.sqrt(C)              # nn.Linear-style init
        weight = jax.random.uniform(kw, (C, E), minval=-bound, maxval=bound,
                                    dtype=jnp.float32)
        bias = jax.random.uniform(kb, (E,), minval=-bound, maxval=bound,
                                  dtype=jnp.float32)
        return x, weight, bias

    def check(out, x, w, b, *, bf16_operands, atol, rtol):
        if bf16_operands:
            xr = x.astype(jnp.bfloat16).astype(jnp.float32)
            wr = w.astype(jnp.bfloat16).astype(jnp.float32)
        else:
            xr, wr = x, w
        ref = _reference(xr, wr, b)
        assert out.shape == ref.shape, (out.shape, ref.shape)
        err = float(jnp.max(jnp.abs(out - ref)))
        assert jnp.allclose(out, ref, atol=atol, rtol=rtol), err

    # 1) Main demo shape: k=32 fold, bf16 MXU operands, f32 accumulate.
    x, w, b = make_inputs(jax.random.PRNGKey(0), B=2, C=4, H=16, W=16, E=32)
    out = jax.block_until_ready(pixel_embed_linear(x, w, b))
    assert out.shape == (2, 16 * 16, 32)
    check(out, x, w, b, bf16_operands=True, atol=1e-3, rtol=1e-3)   # tight, vs bf16-rounded ref
    check(out, x, w, b, bf16_operands=False, atol=5e-2, rtol=5e-2)  # sanity, vs f32 ref

    # 2) Same shape, pure-f32 matmul path.
    out = jax.block_until_ready(pixel_embed_linear(x, w, b, mxu_dtype=None))
    check(out, x, w, b, bf16_operands=False, atol=5e-2, rtol=5e-2)

    # 3) Ragged pixel count (pad-to-sublane + ragged grid + [:M] slice).
    x, w, b = make_inputs(jax.random.PRNGKey(1), B=2, C=4, H=15, W=15, E=32)
    out = jax.block_until_ready(pixel_embed_linear(x, w, b))
    check(out, x, w, b, bf16_operands=True, atol=1e-3, rtol=1e-3)

    # 4) Channel count that does not divide 128 -> output-only fold (k=4).
    x, w, b = make_inputs(jax.random.PRNGKey(2), B=2, C=5, H=16, W=16, E=32)
    out = jax.block_until_ready(pixel_embed_linear(x, w, b))
    check(out, x, w, b, bf16_operands=True, atol=1e-3, rtol=1e-3)

    # 5) E already a multiple of 128 -> no fold (k=1), lane-dense output as-is.
    x, w, b = make_inputs(jax.random.PRNGKey(3), B=2, C=4, H=16, W=16, E=128)
    out = jax.block_until_ready(pixel_embed_linear(x, w, b))
    check(out, x, w, b, bf16_operands=True, atol=1e-3, rtol=1e-3)

    print("KERNEL_OK")
</pallas_src>

<mosaic_0001>
module attributes {stable_mosaic.version = 11 : i64} {
  func.func @_pixel_embed_kernel(%arg0: i32, %arg1: memref<16x128xf32, #tpu.memory_space<vmem>>, %arg2: memref<128x1024xbf16, #tpu.memory_space<vmem>>, %arg3: memref<1x1024xf32, #tpu.memory_space<vmem>>, %arg4: memref<16x1024xf32, #tpu.memory_space<vmem>>) attributes {dimension_semantics = [#tpu.dimension_semantics<parallel>], iteration_bounds = array<i64: 1>, scalar_prefetch = 0 : i64, scratch_operands = 0 : i64, tpu.core_type = #tpu.core_type<tc>, window_params = [{transform_indices = @transform_0, window_bounds = array<i64: 16, 128>}, {pipeline_mode = #tpu.pipeline_mode<synchronous>, transform_indices = @transform_1, window_bounds = array<i64: 128, 1024>}, {pipeline_mode = #tpu.pipeline_mode<synchronous>, transform_indices = @transform_2, window_bounds = array<i64: 1, 1024>}, {transform_indices = @transform_3, window_bounds = array<i64: 16, 1024>}]} {
    %c0 = arith.constant 0 : index
    %c0_0 = arith.constant 0 : index
    %0 = vector.load %arg1[%c0, %c0_0] : memref<16x128xf32, #tpu.memory_space<vmem>>, vector<16x128xf32>
    %c0_1 = arith.constant 0 : index
    %c0_2 = arith.constant 0 : index
    %1 = vector.load %arg2[%c0_1, %c0_2] : memref<128x1024xbf16, #tpu.memory_space<vmem>>, vector<128x1024xbf16>
    %2 = arith.truncf %0 : vector<16x128xf32> to vector<16x128xbf16>
    %cst = arith.constant dense<0.000000e+00> : vector<16x1024xf32>
    %3 = tpu.matmul %2, %1, %cst {dimension_numbers = #tpu.dot_dimension_numbers<[1], [0], [0], [1], [0, 0, 1, 1], [], []>} : vector<16x128xbf16>, vector<128x1024xbf16>, vector<16x1024xf32> -> vector<16x1024xf32>
    %c0_3 = arith.constant 0 : index
    %c0_4 = arith.constant 0 : index
    %4 = vector.load %arg3[%c0_3, %c0_4] : memref<1x1024xf32, #tpu.memory_space<vmem>>, vector<1x1024xf32>
    %5 = vector.broadcast %4 : vector<1x1024xf32> to vector<16x1024xf32>
    %6 = arith.addf %3, %5 : vector<16x1024xf32>
    %c0_5 = arith.constant 0 : index
    %c0_6 = arith.constant 0 : index
    %7 = vector.load %arg4[%c0_5, %c0_6] : memref<16x1024xf32, #tpu.memory_space<vmem>>, vector<16x1024xf32>
    tpu.vector_store %arg4[%c0_5, %c0_6], %6 {strides = array<i32>} : memref<16x1024xf32, #tpu.memory_space<vmem>>, vector<16x1024xf32>,
    return
  }
  func.func @transform_0(%arg0: i32) -> (i32, i32) {
    %c0_i32 = arith.constant 0 : i32
    %c0_i32_0 = arith.constant 0 : i32
    return %arg0, %c0_i32 : i32, i32
  }
  func.func @transform_1(%arg0: i32) -> (i32, i32) {
    %c0_i32 = arith.constant 0 : i32
    %c0_i32_0 = arith.constant 0 : i32
    %c0_i32_1 = arith.constant 0 : i32
    return %c0_i32, %c0_i32_0 : i32, i32
  }
  func.func @transform_2(%arg0: i32) -> (i32, i32) {
    %c0_i32 = arith.constant 0 : i32
    %c0_i32_0 = arith.constant 0 : i32
    %c0_i32_1 = arith.constant 0 : i32
    return %c0_i32, %c0_i32_0 : i32, i32
  }
  func.func @transform_3(%arg0: i32) -> (i32, i32) {
    %c0_i32 = arith.constant 0 : i32
    %c0_i32_0 = arith.constant 0 : i32
    return %arg0, %c0_i32 : i32, i32
  }
}

</mosaic_0001>

<bundles_post_ra>
// kernel: tpu_custom_call.1
= control target key start
LH: loop header
LB: loop body
LE: loop exit
PB: predicated region body
PF: predicated region fallthrough
CT: control target
= control target key end

     0   :  { %8 = vsyncpa [#allocation3], 0  ;;  %s948_s0 = inlined_call_operand.hbm [shape: f32[16,128], index: 0, kind: input, shape index: {}]   ;;  %s949_s1 = inlined_call_operand.hbm [shape: bf16[128,1024], index: 1, kind: input, shape index: {}]   ;;  %s950_s2 = inlined_call_operand.hbm [shape: f32[1,1024], index: 2, kind: input, shape index: {}]   ;;  %s951_s3 = inlined_call_operand.hbm [shape: f32[16,1024], index: 3, kind: output, shape index: {}]  }
   0x1   :  { %9 = vsyncpa [#allocation6], 0 }
   0x2   :  { %10 = vsyncpa [#allocation4], 0  ;;  %s859_s12 = smov [#allocation5]   ;;  %s765_s16 = scalar_lea.hbm %s949_s1, 8192 }
   0x3   :  { %s28_s13 = sshll.u32 %s859_s12, 4  ;;  %p766_p0 = scmp.ne.s32.totalorder %s949_s1, %s765_s16  ;;  %s29_s13 = int_to_ptr.vmem [resolvable:$true] %s28_s13 }
   0x4   :  { %p769_p1 = scmp.lt.u32.totalorder %s765_s16, %s949_s1 }
   0x6   :  { %p771_p2 = pnand %p769_p1, %p766_p0 }
   0x8   :  { %774 = shalt.err (!%p771_p2)
}
   0x9   :  { %s775_s21 = scalar_lea.vmem %s29_s13, 8192  ;;  %p780_p4 = scmp.lt.s32.totalorder %s29_s13, %s29_s13 }
   0xa   :  { %p776_p3 = scmp.ne.s32.totalorder %s29_s13, %s775_s21  ;;  %p781_p5 = scmp.lt.s32.totalorder %s775_s21, %s775_s21 }
   0xc   :  { %p782_p6 = por %p781_p5, %p780_p4 }
   0xe   :  { %p783_p7 = pnand %p782_p6, %p776_p3 }
  0x10   :  { %786 = shalt.err (!%p783_p7)
}
  0x11   :  { %s860_s22 = smov 512   ;;  %s861_s23 = smov 32  }
  0x12   :  { %34 = dma.hbm_to_vmem [thread:$0]  %s949_s1, 8192, %s29_s13, [#allocation6], %s860_s22, %s860_s22, %s861_s23  }
  0x13   :  { %s862_s26 = smov [#allocation2]   ;;  %s787_s30 = scalar_lea.hbm %s948_s0, 256 }
  0x14   :  { %s16_s27 = sshll.u32 %s862_s26, 4  ;;  %p788_p8 = scmp.ne.s32.totalorder %s948_s0, %s787_s30  ;;  %s17_s27 = int_to_ptr.vmem [resolvable:$true] %s16_s27 }
  0x15   :  { %p791_p9 = scmp.lt.u32.totalorder %s787_s30, %s948_s0 }
  0x17   :  { %p793_p10 = pnand %p791_p9, %p788_p8 }
  0x19   :  { %796 = shalt.err (!%p793_p10)
}
  0x1a   :  { %s797_s8 = scalar_lea.vmem %s17_s27, 256  ;;  %p802_p12 = scmp.lt.s32.totalorder %s17_s27, %s17_s27 }
  0x1b   :  { %p798_p11 = scmp.ne.s32.totalorder %s17_s27, %s797_s8  ;;  %p803_p13 = scmp.lt.s32.totalorder %s797_s8, %s797_s8 }
  0x1d   :  { %p804_p0 = por %p803_p13, %p802_p12 }
  0x1f   :  { %p805_p1 = pnand %p804_p0, %p798_p11 }
  0x21   :  { %808 = shalt.err (!%p805_p1)
}
  0x22   :  { %s863_s1 = smov 128   ;;  %s864_s9 = smov 8  }
  0x23   :  { %22 = dma.hbm_to_vmem [thread:$0]  %s948_s0, 256, %s17_s27, [#allocation3], %s863_s1, %s863_s1, %s864_s9  }
  0x24   :  { %s865_s12 = smov [#allocation7]   ;;  %s809_s16 = scalar_lea.hbm %s950_s2, 128 }
  0x25   :  { %s41_s13 = sshll.u32 %s865_s12, 4  ;;  %p810_p2 = scmp.ne.s32.totalorder %s950_s2, %s809_s16  ;;  %s42_s13 = int_to_ptr.vmem [resolvable:$true] %s41_s13 }
  0x26   :  { %p813_p3 = scmp.lt.u32.totalorder %s809_s16, %s950_s2 }
  0x28   :  { %p815_p4 = pnand %p813_p3, %p810_p2 }
  0x2a   :  { %818 = shalt.err (!%p815_p4)
}
  0x2b   :  { %s819_s21 = scalar_lea.vmem %s42_s13, 128  ;;  %p824_p6 = scmp.lt.s32.totalorder %s42_s13, %s42_s13 }
  0x2c   :  { %p820_p5 = scmp.ne.s32.totalorder %s42_s13, %s819_s21  ;;  %p825_p7 = scmp.lt.s32.totalorder %s819_s21, %s819_s21 }
  0x2e   :  { %p826_p8 = por %p825_p7, %p824_p6 }
  0x30   :  { %p827_p9 = pnand %p826_p8, %p820_p5 }
  0x32   :  { %830 = shalt.err (!%p827_p9)
}
  0x33   :  { %44 = dma.hbm_to_vmem [thread:$0]  %s950_s2, 128, %s42_s13, [#allocation6]  }
  0x34   :  { %853 = dma.done.wait [#allocation3], 256  }
  0x35   :  { %854 = vsyncadd [#allocation3], 4294967040 }
  0x36   :  { %855 = dma.done.wait [#allocation6], 8320  }
  0x37   :  { %856 = vsyncadd [#allocation6], 4294958976  ;;  %v866_v0 = vmov 0   ;;  %v57_v1 = vld [vmem:[#allocation5] sm:$0xff]  ;;  %v58_v3 = vld [vmem:[#allocation5 + $0x8] sm:$0xff]  ;;  %s867_s2 = smov [#allocation8]  }
  0x38   :  { %516 = vmatprep.mubr.bf16.mxu0 %v866_v0  ;;  %559 = vmatprep.mubr.bf16.mxu1 %v866_v0  ;;  %v61_v2 = vld [vmem:[#allocation5 + $0x20] sm:$0xff]  ;;  %v62_v5 = vld [vmem:[#allocation5 + $0x28] sm:$0xff]  ;;  %v59_v63 = vld [vmem:[#allocation5 + $0x10] sm:$0xff]  ;;  %s677_s23 = sshll.u32 %s867_s2, 4  ;;  %s678_s23 = int_to_ptr.vmem [resolvable:$true] %s677_s23 }
  0x39   :  { %v691_v4 = vcombine.high %v57_v1, %v61_v2  ;;  %v690_v6 = vcombine.low %v57_v1, %v61_v2  ;;  %v65_v7 = vld [vmem:[#allocation5 + $0x40] sm:$0xff]  ;;  %v693_v9 = vcombine.high %v58_v3, %v62_v5  ;;  %v692_v10 = vcombine.low %v58_v3, %v62_v5  ;;  %v66_v12 = vld [vmem:[#allocation5 + $0x48] sm:$0xff]  ;;  %v63_v1 = vld [vmem:[#allocation5 + $0x30] sm:$0xff]  ;;  %s831_s24 = scalar_lea.vmem %s678_s23, 2048  ;;  %p836_p11 = scmp.lt.s32.totalorder %s678_s23, %s678_s23 }
  0x3a   :  { %v69_v8 = vld [vmem:[#allocation5 + $0x60] sm:$0xff]  ;;  %v70_v13 = vld [vmem:[#allocation5 + $0x68] sm:$0xff]  ;;  %v60_v2 = vld [vmem:[#allocation5 + $0x18] sm:$0xff]  ;;  %p832_p10 = scmp.ne.s32.totalorder %s678_s23, %s831_s24  ;;  %p837_p12 = scmp.lt.s32.totalorder %s831_s24, %s831_s24 }
  0x3b   :  { %v699_v11 = vcombine.high %v65_v7, %v69_v8  ;;  %v73_v14 = vld [vmem:[#allocation5 + $0x80] sm:$0xff]  ;;  %484 = vmatprep.subr.bf16.mxu0 %v691_v4  ;;  %v701_v15 = vcombine.high %v66_v12, %v70_v13  ;;  %v74_v17 = vld [vmem:[#allocation5 + $0x88] sm:$0xff]  ;;  %527 = vmatprep.subr.bf16.mxu1 %v693_v9  ;;  %v698_v19 = vcombine.low %v65_v7, %v69_v8  ;;  %v64_v3 = vld [vmem:[#allocation5 + $0x38] sm:$0xff] }
  0x3c   :  { %v77_v16 = vld [vmem:[#allocation5 + $0xa0] sm:$0xff]  ;;  %v78_v18 = vld [vmem:[#allocation5 + $0xa8] sm:$0xff]  ;;  %485 = vmatpush1.bf16.msra.mxu0 %v690_v6  ;;  %528 = vmatpush1.bf16.msra.mxu1 %v692_v10  ;;  %v700_v20 = vcombine.low %v66_v12, %v70_v13  ;;  %v55_v5 = vld [vmem:[#allocation2] sm:$0xff]  ;;  %v695_v8 = vcombine.high %v59_v63, %v63_v1  ;;  %v697_v9 = vcombine.high %v60_v2, %v64_v3  ;;  %p838_p13 = por %p837_p12, %p836_p11 }
  0x3d   :  { %486 = vmatprep.subr.bf16.mxu0 %v699_v11  ;;  %v707_v21 = vcombine.high %v73_v14, %v77_v16  ;;  %529 = vmatprep.subr.bf16.mxu1 %v701_v15  ;;  %v709_v22 = vcombine.high %v74_v17, %v78_v18  ;;  %v81_v23 = vld [vmem:[#allocation5 + $0xc0] sm:$0xff]  ;;  %v82_v25 = vld [vmem:[#allocation5 + $0xc8] sm:$0xff]  ;;  %v706_v27 = vcombine.low %v73_v14, %v77_v16  ;;  %v56_v6 = vld [vmem:[#allocation2 + $0x8] sm:$0xff] }
  0x3e   :  { %v85_v24 = vld [vmem:[#allocation5 + $0xe0] sm:$0xff]  ;;  %v86_v26 = vld [vmem:[#allocation5 + $0xe8] sm:$0xff]  ;;  %v708_v28 = vcombine.low %v74_v17, %v78_v18  ;;  %v67_v10 = vld [vmem:[#allocation5 + $0x50] sm:$0xff]  ;;  %v928_v12 = vpack.c.bf16 %v56_v6, %v55_v5  ;;  %v694_v15 = vcombine.low %v59_v63, %v63_v1  ;;  %v696_v16 = vcombine.low %v60_v2, %v64_v3  ;;  %p839_p0 = pnand %p838_p13, %p832_p10 }
  0x3f   :  { %v715_v29 = vcombine.high %v81_v23, %v85_v24  ;;  %v717_v30 = vcombine.high %v82_v25, %v86_v26  ;;  %v89_v31 = vld [vmem:[#allocation5 + $0x100] sm:$0xff]  ;;  %v90_v33 = vld [vmem:[#allocation5 + $0x108] sm:$0xff]  ;;  %v714_v35 = vcombine.low %v81_v23, %v85_v24  ;;  %v716_v36 = vcombine.low %v82_v25, %v86_v26  ;;  %v71_v11 = vld [vmem:[#allocation5 + $0x70] sm:$0xff] }
  0x40   :  { %487 = vmatpush1.bf16.msra.mxu0 %v698_v19  ;;  %530 = vmatpush1.bf16.msra.mxu1 %v700_v20  ;;  %v93_v32 = vld [vmem:[#allocation5 + $0x120] sm:$0xff]  ;;  %v94_v34 = vld [vmem:[#allocation5 + $0x128] sm:$0xff]  ;;  %v68_v13 = vld [vmem:[#allocation5 + $0x58] sm:$0xff]  ;;  %v703_v17 = vcombine.high %v67_v10, %v71_v11  ;;  %v702_v23 = vcombine.low %v67_v10, %v71_v11  ;;  %v124_v5 = vlaneseq }
  0x41   :  { %488 = vmatprep.subr.bf16.mxu0 %v707_v21  ;;  %531 = vmatprep.subr.bf16.mxu1 %v709_v22  ;;  %v723_v37 = vcombine.high %v89_v31, %v93_v32  ;;  %v725_v38 = vcombine.high %v90_v33, %v94_v34  ;;  %v97_v39 = vld [vmem:[#allocation5 + $0x140] sm:$0xff]  ;;  %v98_v41 = vld [vmem:[#allocation5 + $0x148] sm:$0xff]  ;;  %v722_v43 = vcombine.low %v89_v31, %v93_v32  ;;  %v72_v14 = vld [vmem:[#allocation5 + $0x78] sm:$0xff] }
  0x42   :  { %v101_v40 = vld [vmem:[#allocation5 + $0x160] sm:$0xff]  ;;  %v102_v42 = vld [vmem:[#allocation5 + $0x168] sm:$0xff]  ;;  %v724_v44 = vcombine.low %v90_v33, %v94_v34  ;;  %v705_v18 = vcombine.high %v68_v13, %v72_v14  ;;  %v75_v19 = vld [vmem:[#allocation5 + $0x90] sm:$0xff]  ;;  %v704_v24 = vcombine.low %v68_v13, %v72_v14  ;;  %v125_v6 = vshrl.u32 %v124_v5, 7 }
  0x43   :  { %v731_v45 = vcombine.high %v97_v39, %v101_v40  ;;  %v733_v46 = vcombine.high %v98_v41, %v102_v42  ;;  %v105_v47 = vld [vmem:[#allocation5 + $0x180] sm:$0xff]  ;;  %v106_v49 = vld [vmem:[#allocation5 + $0x188] sm:$0xff]  ;;  %v730_v51 = vcombine.low %v97_v39, %v101_v40  ;;  %v732_v52 = vcombine.low %v98_v41, %v102_v42  ;;  %v79_v20 = vld [vmem:[#allocation5 + $0xb0] sm:$0xff] }
  0x44   :  { %489 = vmatpush1.bf16.msra.mxu0 %v706_v27  ;;  %532 = vmatpush1.bf16.msra.mxu1 %v708_v28  ;;  %v109_v48 = vld [vmem:[#allocation5 + $0x1a0] sm:$0xff]  ;;  %v110_v50 = vld [vmem:[#allocation5 + $0x1a8] sm:$0xff]  ;;  %v76_v21 = vld [vmem:[#allocation5 + $0x98] sm:$0xff]  ;;  %v711_v25 = vcombine.high %v75_v19, %v79_v20  ;;  %v710_v31 = vcombine.low %v75_v19, %v79_v20  ;;  %v130_v10 = vsub.s32 1, %v125_v6  ;;  %v138_v11 = vsub.s32 3, %v125_v6 }
  0x45   :  { %490 = vmatprep.subr.bf16.mxu0 %v715_v29  ;;  %533 = vmatprep.subr.bf16.mxu1 %v717_v30  ;;  %v739_v53 = vcombine.high %v105_v47, %v109_v48  ;;  %v741_v54 = vcombine.high %v106_v49, %v110_v50  ;;  %v113_v55 = vld [vmem:[#allocation5 + $0x1c0] sm:$0xff]  ;;  %v114_v57 = vld [vmem:[#allocation5 + $0x1c8] sm:$0xff]  ;;  %v738_v59 = vcombine.low %v105_v47, %v109_v48  ;;  %v80_v22 = vld [vmem:[#allocation5 + $0xb8] sm:$0xff] }
  0x46   :  { %v117_v56 = vld [vmem:[#allocation5 + $0x1e0] sm:$0xff]  ;;  %v118_v58 = vld [vmem:[#allocation5 + $0x1e8] sm:$0xff]  ;;  %v740_v60 = vcombine.low %v106_v49, %v110_v50  ;;  %v713_v26 = vcombine.high %v76_v21, %v80_v22  ;;  %v83_v27 = vld [vmem:[#allocation5 + $0xd0] sm:$0xff]  ;;  %v712_v32 = vcombine.low %v76_v21, %v80_v22 }
  0x47   :  { %v747_v61 = vcombine.high %v113_v55, %v117_v56  ;;  %v749_v62 = vcombine.high %v114_v57, %v118_v58  ;;  %v746_v4 = vcombine.low %v113_v55, %v117_v56  ;;  %v748_v7 = vcombine.low %v114_v57, %v118_v58  ;;  %v87_v28 = vld [vmem:[#allocation5 + $0xf0] sm:$0xff]  ;;  %v84_v29 = vld [vmem:[#allocation5 + $0xd8] sm:$0xff] }
  0x48   :  { %491 = vmatpush1.bf16.msra.mxu0 %v714_v35  ;;  %534 = vmatpush1.bf16.msra.mxu1 %v716_v36  ;;  %v88_v30 = vld [vmem:[#allocation5 + $0xf8] sm:$0xff]  ;;  %v719_v33 = vcombine.high %v83_v27, %v87_v28  ;;  %v91_v35 = vld [vmem:[#allocation5 + $0x110] sm:$0xff]  ;;  %v718_v39 = vcombine.low %v83_v27, %v87_v28 }
  0x49   :  { %492 = vmatprep.subr.bf16.mxu0 %v723_v37  ;;  %535 = vmatprep.subr.bf16.mxu1 %v725_v38  ;;  %v721_v34 = vcombine.high %v84_v29, %v88_v30  ;;  %v95_v36 = vld [vmem:[#allocation5 + $0x130] sm:$0xff]  ;;  %v92_v37 = vld [vmem:[#allocation5 + $0x118] sm:$0xff]  ;;  %v720_v40 = vcombine.low %v84_v29, %v88_v30 }
  0x4a   :  { %v96_v38 = vld [vmem:[#allocation5 + $0x138] sm:$0xff]  ;;  %v727_v41 = vcombine.high %v91_v35, %v95_v36  ;;  %v99_v42 = vld [vmem:[#allocation5 + $0x150] sm:$0xff] }
  0x4b   :  { %v728_v47 = vcombine.low %v92_v37, %v96_v38  ;;  %v107_v50 = vld [vmem:[#allocation5 + $0x190] sm:$0xff] }
  0x4c   :  { %493 = vmatpush1.bf16.msra.mxu0 %v722_v43  ;;  %536 = vmatpush1.bf16.msra.mxu1 %v724_v44  ;;  %v103_v43 = vld [vmem:[#allocation5 + $0x170] sm:$0xff]  ;;  %v100_v44 = vld [vmem:[#allocation5 + $0x158] sm:$0xff] }
  0x4d   :  { %494 = vmatprep.subr.bf16.mxu0 %v731_v45  ;;  %537 = vmatprep.subr.bf16.mxu1 %v733_v46  ;;  %v104_v45 = vld [vmem:[#allocation5 + $0x178] sm:$0xff]  ;;  %v726_v46 = vcombine.low %v91_v35, %v95_v36  ;;  %v735_v48 = vcombine.high %v99_v42, %v103_v43  ;;  %v115_v58 = vld [vmem:[#allocation5 + $0x1d0] sm:$0xff]  ;;  %v154_v35 = vsub.s32 7, %v125_v6 }
  0x4e   :  { %v737_v49 = vcombine.high %v100_v44, %v104_v45  ;;  %v736_v55 = vcombine.low %v100_v44, %v104_v45 }
  0x50   :  { %495 = vmatpush1.bf16.msra.mxu0 %v730_v51  ;;  %538 = vmatpush1.bf16.msra.mxu1 %v732_v52  ;;  %v111_v51 = vld [vmem:[#allocation5 + $0x1b0] sm:$0xff]  ;;  %v108_v52 = vld [vmem:[#allocation5 + $0x198] sm:$0xff] }
  0x51   :  { %496 = vmatprep.subr.bf16.mxu0 %v739_v53  ;;  %539 = vmatprep.subr.bf16.mxu1 %v741_v54  ;;  %v112_v53 = vld [vmem:[#allocation5 + $0x1b8] sm:$0xff]  ;;  %v734_v54 = vcombine.low %v99_v42, %v103_v43  ;;  %v743_v56 = vcombine.high %v107_v50, %v111_v51 }
  0x52   :  { %v745_v57 = vcombine.high %v108_v52, %v112_v53  ;;  %v744_v63 = vcombine.low %v108_v52, %v112_v53 }
  0x54   :  { %497 = vmatpush1.bf16.msra.mxu0 %v738_v59  ;;  %540 = vmatpush1.bf16.msra.mxu1 %v740_v60  ;;  %v119_v59 = vld [vmem:[#allocation5 + $0x1f0] sm:$0xff]  ;;  %v116_v60 = vld [vmem:[#allocation5 + $0x1d8] sm:$0xff] }
  0x55   :  { %498 = vmatprep.subr.bf16.mxu0 %v747_v61  ;;  %541 = vmatprep.subr.bf16.mxu1 %v749_v62  ;;  %v120_v61 = vld [vmem:[#allocation5 + $0x1f8] sm:$0xff]  ;;  %v742_v62 = vcombine.low %v107_v50, %v111_v51  ;;  %v751_v1 = vcombine.high %v115_v58, %v119_v59  ;;  %v750_v3 = vcombine.low %v115_v58, %v119_v59 }
  0x56   :  { %v753_v2 = vcombine.high %v116_v60, %v120_v61 }
  0x58   :  { %499 = vmatpush1.bf16.msra.mxu0 %v746_v4  ;;  %542 = vmatpush1.bf16.msra.mxu1 %v748_v7  ;;  %v752_v4 = vcombine.low %v116_v60, %v120_v61  ;;  %v126_v7 = vsub.s32 0, %v125_v6 }
  0x59   :  { %570 = vmatprep.subr.bf16.mxu0 %v695_v8  ;;  %613 = vmatprep.subr.bf16.mxu1 %v697_v9  ;;  %v122_v8 = vld [vmem:[#allocation7] sm:$0xff]  ;;  %v134_v9 = vsub.s32 2, %v125_v6 }
  0x5a   :  { %v127_v13 = vrot.slane %v122_v8, %v126_v7 }
  0x5b   :  { %517 = vmatmul.mubr.bf16.vlgmr.msra.gmra.mrb[0].mxu0 %v928_v12  ;;  %560 = vmatmul.mubr.bf16.vlgmr.msra.gmra.mrb[0].mxu1 %v928_v12  ;;  %v135_v14 = vrot.slane %v122_v8, %v134_v9 }
  0x5c   :  { %571 = vmatpush1.bf16.msra.mxu0 %v694_v15  ;;  %614 = vmatpush1.bf16.msra.mxu1 %v696_v16  ;;  %v131_v15 = vrot.slane %v122_v8, %v130_v10  ;;  %v139_v16 = vrot.slane %v122_v8, %v138_v11 }
  0x5d   :  { %572 = vmatprep.subr.bf16.mxu0 %v703_v17  ;;  %615 = vmatprep.subr.bf16.mxu1 %v705_v18 }
  0x5e   :  { %602 = vmatprep.mubr.bf16.mxu0 %v866_v0  ;;  %645 = vmatprep.mubr.bf16.mxu1 %v866_v0  ;;  %v729_v0 = vcombine.high %v92_v37, %v96_v38 }
  0x60   :  { %573 = vmatpush1.bf16.msra.mxu0 %v702_v23  ;;  %616 = vmatpush1.bf16.msra.mxu1 %v704_v24 }
  0x61   :  { %574 = vmatprep.subr.bf16.mxu0 %v711_v25  ;;  %617 = vmatprep.subr.bf16.mxu1 %v713_v26 }
  0x64   :  { %575 = vmatpush1.bf16.msra.mxu0 %v710_v31  ;;  %618 = vmatpush1.bf16.msra.mxu1 %v712_v32  ;;  %v142_v32 = vsub.s32 4, %v125_v6 }
  0x65   :  { %576 = vmatprep.subr.bf16.mxu0 %v719_v33  ;;  %619 = vmatprep.subr.bf16.mxu1 %v721_v34  ;;  %v150_v33 = vsub.s32 6, %v125_v6  ;;  %v146_v34 = vsub.s32 5, %v125_v6 }
  0x66   :  { %v143_v36 = vrot.slane %v122_v8, %v142_v32 }
  0x67   :  { %v151_v37 = vrot.slane %v122_v8, %v150_v33  ;;  %v147_v38 = vrot.slane %v122_v8, %v146_v34 }
  0x68   :  { %577 = vmatpush1.bf16.msra.mxu0 %v718_v39  ;;  %620 = vmatpush1.bf16.msra.mxu1 %v720_v40  ;;  %v155_v39 = vrot.slane %v122_v8, %v154_v35 }
  0x69   :  { %578 = vmatprep.subr.bf16.mxu0 %v727_v41  ;;  %621 = vmatprep.subr.bf16.mxu1 %v729_v0 }
  0x6c   :  { %579 = vmatpush1.bf16.msra.mxu0 %v726_v46  ;;  %622 = vmatpush1.bf16.msra.mxu1 %v728_v47 }
  0x6d   :  { %580 = vmatprep.subr.bf16.mxu0 %v735_v48  ;;  %623 = vmatprep.subr.bf16.mxu1 %v737_v49 }
  0x70   :  { %581 = vmatpush1.bf16.msra.mxu0 %v734_v54  ;;  %624 = vmatpush1.bf16.msra.mxu1 %v736_v55 }
  0x71   :  { %582 = vmatprep.subr.bf16.mxu0 %v743_v56  ;;  %625 = vmatprep.subr.bf16.mxu1 %v745_v57 }
  0x74   :  { %583 = vmatpush1.bf16.msra.mxu0 %v742_v62  ;;  %626 = vmatpush1.bf16.msra.mxu1 %v744_v63 }
  0x75   :  { %584 = vmatprep.subr.bf16.mxu0 %v751_v1  ;;  %627 = vmatprep.subr.bf16.mxu1 %v753_v2 }
  0x78   :  { %585 = vmatpush1.bf16.msra.mxu0 %v750_v3  ;;  %628 = vmatpush1.bf16.msra.mxu1 %v752_v4 }
  0x7b   :  { %603 = vmatmul.mubr.bf16.vlgmr.msra.gmra.mrb[4].mxu0 %v928_v12  ;;  %646 = vmatmul.mubr.bf16.vlgmr.msra.gmra.mrb[4].mxu1 %v928_v12 }
 0x12e   :  { %v518_v17 = vpop.f32.mrb[0].mxu0  ;;  %v561_v19 = vpop.f32.mrb[0].mxu1 }
 0x12f   :  { %v519_v18 = vadd.f32 %v518_v17, %v127_v13  ;;  %v520_v20 = vpop.f32.mrb[1].mxu0  ;;  %v562_v21 = vadd.f32 %v561_v19, %v135_v14  ;;  %v563_v23 = vpop.f32.mrb[1].mxu1 }
 0x130   :  { %v521_v22 = vadd.f32 %v520_v20, %v131_v15  ;;  %v522_v24 = vpop.f32.mrb[2].mxu0  ;;  %v564_v12 = vadd.f32 %v563_v23, %v139_v16  ;;  %v565_v26 = vpop.f32.mrb[2].mxu1 }
 0x131   :  { %656 = vst [vmem:[#allocation8] sm:$0xff] %v519_v18  ;;  %v523_v25 = vadd.f32 %v522_v24, %v127_v13  ;;  %v524_v27 = vpop.f32.mrb[3].mxu0  ;;  %658 = vst [vmem:[#allocation8 + $0x10] sm:$0xff] %v562_v21  ;;  %v566_v28 = vadd.f32 %v565_v26, %v135_v14  ;;  %v567_v30 = vpop.f32.mrb[3].mxu1 }
 0x132   :  { %657 = vst [vmem:[#allocation8 + $0x8] sm:$0xff] %v521_v22  ;;  %v525_v29 = vadd.f32 %v524_v27, %v131_v15  ;;  %659 = vst [vmem:[#allocation8 + $0x18] sm:$0xff] %v564_v12  ;;  %v568_v31 = vadd.f32 %v567_v30, %v139_v16 }
 0x133   :  { %664 = vst [vmem:[#allocation8 + $0x40] sm:$0xff] %v523_v25  ;;  %666 = vst [vmem:[#allocation8 + $0x50] sm:$0xff] %v566_v28 }
 0x134   :  { %665 = vst [vmem:[#allocation8 + $0x48] sm:$0xff] %v525_v29  ;;  %667 = vst [vmem:[#allocation8 + $0x58] sm:$0xff] %v568_v31 }
 0x14e   :  { %v604_v40 = vpop.f32.mrb[4].mxu0  ;;  %v647_v0 = vpop.f32.mrb[4].mxu1 }
 0x14f   :  { %v605_v41 = vadd.f32 %v604_v40, %v143_v36  ;;  %v606_v42 = vpop.f32.mrb[5].mxu0  ;;  %v648_v43 = vadd.f32 %v647_v0, %v151_v37  ;;  %v649_v45 = vpop.f32.mrb[5].mxu1 }
 0x150   :  { %v607_v44 = vadd.f32 %v606_v42, %v147_v38  ;;  %v608_v46 = vpop.f32.mrb[6].mxu0  ;;  %v650_v47 = vadd.f32 %v649_v45, %v155_v39  ;;  %v651_v49 = vpop.f32.mrb[6].mxu1 }
 0x151   :  { %660 = vst [vmem:[#allocation8 + $0x20] sm:$0xff] %v605_v41  ;;  %v609_v48 = vadd.f32 %v608_v46, %v143_v36  ;;  %v610_v50 = vpop.f32.mrb[7].mxu0  ;;  %662 = vst [vmem:[#allocation8 + $0x30] sm:$0xff] %v648_v43  ;;  %v652_v51 = vadd.f32 %v651_v49, %v151_v37  ;;  %v653_v53 = vpop.f32.mrb[7].mxu1 }
 0x152   :  { %661 = vst [vmem:[#allocation8 + $0x28] sm:$0xff] %v607_v44  ;;  %v611_v52 = vadd.f32 %v610_v50, %v147_v38  ;;  %663 = vst [vmem:[#allocation8 + $0x38] sm:$0xff] %v650_v47  ;;  %v654_v54 = vadd.f32 %v653_v53, %v155_v39 }
 0x153   :  { %668 = vst [vmem:[#allocation8 + $0x60] sm:$0xff] %v609_v48  ;;  %670 = vst [vmem:[#allocation8 + $0x70] sm:$0xff] %v652_v51 }
 0x154   :  { %669 = vst [vmem:[#allocation8 + $0x68] sm:$0xff] %v611_v52  ;;  %671 = vst [vmem:[#allocation8 + $0x78] sm:$0xff] %v654_v54 }
 0x155   :  { %842 = shalt.err (!%p839_p0)
}
 0x156   :  { %s843_s27 = scalar_lea.hbm %s951_s3, 2048 }
 0x157   :  { %p844_p1 = scmp.ne.s32.totalorder %s951_s3, %s843_s27  ;;  %p847_p2 = scmp.lt.u32.totalorder %s843_s27, %s951_s3 }
 0x159   :  { %p849_p3 = pnand %p847_p2, %p844_p1 }
 0x15b   :  { %852 = shalt.err (!%p849_p3)
}
 0x15c   :  { %s868_s5 = smov 1024   ;;  %s869_s6 = smov 64  }
 0x15d   :  { %683 = dma.vmem_to_hbm [thread:$0]  %s678_s23, 2048, %s951_s3, [#allocation4], %s868_s5, %s868_s5, %s869_s6  }
 0x15e   :  { %857 = dma.done.wait [#allocation4], 2048  }
 0x15f   :  { %858 = vsyncadd [#allocation4], 4294965248 }
 0x160   :  { %687 = vsyncpa [#allocation3], 1 }
 0x161   :  { %688 = vsyncpa [#allocation6], 1 }
 0x162   :  { %689 = vsyncpa [#allocation4], 1 }

</bundles_post_ra>
